<compile_context>
chip_gen: v7x
topology: tpu7x:2x2x1
jax: 0.10.0
libtpu: 0.0.40
codegen_flags: <defaults>
</compile_context>

<pallas_src>
from functools import partial

import jax
import jax.numpy as jnp
from jax.experimental import pallas as pl
from jax.experimental.pallas import tpu as pltpu


def hybrid_kernel(theta_ref, out_ref):
    """Expectation of the 1-qubit H -> RY(theta) -> measure circuit.

    P(|1>) after RY(theta) H |0> is (1 + sin(theta)) / 2, so the measured
    'expectation_z' (sum over basis-state value * probability) equals that.
    One EUP sin + one VPU fma on a single tile.
    """
    out_ref[...] = 0.5 * (1.0 + jnp.sin(theta_ref[...]))


def _hybrid_pallas(x):
    """x: (1, 1) float32 theta tensor -> (1, 1) float32 expectation tensor."""
    # Grid-less call: whole (1,1) array as a single VMEM-resident block.
    return pl.pallas_call(
        hybrid_kernel,
        out_shape=jax.ShapeDtypeStruct(x.shape, x.dtype),
        in_specs=[pl.BlockSpec(memory_space=pltpu.MemorySpace.VMEM)],
        out_specs=pl.BlockSpec(memory_space=pltpu.MemorySpace.VMEM),
    )(x)


@partial(jax.custom_vjp, nondiff_argnums=(1,))
def hybrid_forward(x, shift):
    assert x.ndim == 2 and x.shape == (1, 1), (
        "Hybrid layer binds a single theta; expected a (1, 1) input "
        "(the original module only uses input[0])."
    )
    return _hybrid_pallas(x)


def _hybrid_fwd(x, shift):
    return _hybrid_pallas(x), x


def _hybrid_bwd(shift, x, g):
    # Parameter-shift rule of the original backward (infinite-shot limit):
    #   E(theta + s) - E(theta - s) = sin(s) * cos(theta)
    # Scalar math -> plain JAX, no extra kernel dispatch.
    return (jnp.sin(shift) * jnp.cos(x) * g,)


hybrid_forward.defvjp(_hybrid_fwd, _hybrid_bwd)


class HybridPallas:
    """Mirror of the PyTorch Hybrid module (backend/shots unused in forward)."""

    def __init__(self, backend=None, shots=100, shift=jnp.pi / 2):
        self.shots = shots          # only affects sampling noise (not modeled)
        self.shift = float(shift)   # used by the parameter-shift backward

    def __call__(self, x):
        return hybrid_forward(x, self.shift)


if __name__ == "__main__":
    key = jax.random.PRNGKey(0)
    # Single theta in [-pi, pi], shape (1, 1) — the shape the original layer sees.
    x = jax.random.uniform(
        key, (1, 1), dtype=jnp.float32, minval=-jnp.pi, maxval=jnp.pi
    )

    layer = HybridPallas(backend=None, shots=100, shift=jnp.pi / 2)
    out = jax.block_until_ready(layer(x))

    # Pure-JAX reference check (forward).
    ref = 0.5 * (1.0 + jnp.sin(x))
    assert out.shape == (1, 1)
    assert jnp.allclose(out, ref, atol=1e-6), (out, ref)

    # Backward check: parameter-shift gradient sin(pi/2) * cos(theta).
    grad = jax.block_until_ready(
        jax.grad(lambda t: jnp.sum(layer(t)))(x)
    )
    grad_ref = jnp.sin(layer.shift) * jnp.cos(x)
    assert jnp.allclose(grad, grad_ref, atol=1e-6), (grad, grad_ref)

    print("KERNEL_OK")
</pallas_src>

<mosaic_0001>
module attributes {stable_mosaic.version = 11 : i64} {
  func.func @hybrid_kernel(%arg0: memref<1x1xf32, #tpu.memory_space<vmem>>, %arg1: memref<1x1xf32, #tpu.memory_space<vmem>>) attributes {dimension_semantics = [], scalar_prefetch = 0 : i64, scratch_operands = 0 : i64, tpu.core_type = #tpu.core_type<tc>} {
    %c0 = arith.constant 0 : index
    %c0_0 = arith.constant 0 : index
    %0 = vector.load %arg0[%c0, %c0_0] : memref<1x1xf32, #tpu.memory_space<vmem>>, vector<1x1xf32>
    %1 = math.sin %0 : vector<1x1xf32>
    %cst = arith.constant 1.000000e+00 : f32
    %2 = vector.broadcast %cst : f32 to vector<1x1xf32>
    %3 = arith.addf %2, %1 : vector<1x1xf32>
    %cst_1 = arith.constant 5.000000e-01 : f32
    %4 = vector.broadcast %cst_1 : f32 to vector<1x1xf32>
    %5 = arith.mulf %4, %3 : vector<1x1xf32>
    %c0_2 = arith.constant 0 : index
    %c0_3 = arith.constant 0 : index
    %6 = vector.load %arg1[%c0_2, %c0_3] : memref<1x1xf32, #tpu.memory_space<vmem>>, vector<1x1xf32>
    tpu.vector_store %arg1[%c0_2, %c0_3], %5 {strides = array<i32>} : memref<1x1xf32, #tpu.memory_space<vmem>>, vector<1x1xf32>,
    return
  }
}

</mosaic_0001>

<bundles_post_ra>
// kernel: tpu_custom_call.1
= control target key start
LH: loop header
LB: loop body
LE: loop exit
PB: predicated region body
PF: predicated region fallthrough
CT: control target
= control target key end

     0   :  { %s230_s0 = inlined_call_operand.<no memory space> [shape: f32[1,1], index: 0, kind: input, shape index: {}]   ;;  %s231_s1 = inlined_call_operand.hbm [shape: f32[1,1], index: 1, kind: output, shape index: {}]  }
   0x1   :  { %v6_v0 = vstv %s230_s0 }
   0x2   :  { %7 = vst [vmem:[#allocation2] sm:$0x1] %v6_v0 }
   0x9   :  { %v197_v1 = vld [vmem:[#allocation2] sm:$0x1] }
   0xa   :  { %v15_v2 = vand.u32 2139095040, %v197_v1  ;;  %v12_v4 = vand.u32 2147483647, %v197_v1 }
   0xc   :  { %v16_v3 = vshrl.u32 %v15_v2, 23 }
   0xd   :  { %8 = vsyncpa [#allocation4], 0  ;;  %v19_v7 = vand.u32 8388607, %v12_v4  ;;  %v177_v13 = vmov 683565275   ;;  %vm104_vm12 = vweird.f32 %v197_v1 }
   0xe   :  { %v134_v5 = vadd.s32 4294967169, %v16_v3  ;;  %v178_v15 = vmov 2475754826   ;;  %v179_v17 = vmov 2131351028   ;;  %vm14_vm7 = vcmp.lt.s32.totalorder %v197_v1, 0 }
   0xf   :  { %v20_v10 = vor.u32 8388608, %v19_v7  ;;  %v180_v19 = vmov 2102212464   ;;  %v181_v21 = vmov 920167782   ;;  %s183_s0 = smov [#allocation3]  }
  0x10   :  { %v22_v6 = vadd.s32 1, %v134_v5  ;;  %v182_v28 = vmov 1326507024   ;;  %vm13_vm8 = vcmp.le.f32.partialorder %v12_v4, 0.7853982  ;;  %s126_s8 = sshll.u32 %s183_s0, 4  ;;  %s127_s8 = int_to_ptr.vmem [resolvable:$true] %s126_s8 }
  0x11   :  { %v60_v30 = vshll.u32 %v20_v10, 8  ;;  %vm118_vm13 = vcmask 0   ;;  %s153_s9 = scalar_lea.vmem %s127_s8, 16  ;;  %s157_s10 = scalar_lea.vmem %s127_s8, 32 }
  0x12   :  { %vm23_vm0 = vcmp.gt.s32.totalorder %v22_v6, 0  ;;  %p154_p0 = scmp.ne.s32.totalorder %s127_s8, %s153_s9  ;;  %p158_p1 = scmp.lt.s32.totalorder %s127_s8, %s127_s8 }
  0x13   :  { %v24_v8 = vsel %vm23_vm0, %v22_v6, 0  ;;  %p159_p2 = scmp.lt.s32.totalorder %s157_s10, %s153_s9 }
  0x14   :  { %v26_v9 = vand.u32 31, %v24_v8  ;;  %v25_v11 = vshrl.u32 %v24_v8, 5 }
  0x15   :  { %p160_p3 = por %p159_p2, %p158_p1 }
  0x16   :  { %v27_v12 = vsub.s32 32, %v26_v9  ;;  %v29_v14 = vshll.u32 %v177_v13, %v26_v9  ;;  %v32_v16 = vshll.u32 %v178_v15, %v26_v9  ;;  %v35_v18 = vshll.u32 %v179_v17, %v26_v9 }
  0x17   :  { %v38_v20 = vshll.u32 %v180_v19, %v26_v9  ;;  %v41_v22 = vshll.u32 %v181_v21, %v26_v9  ;;  %vm44_vm1 = vcmp.lt.s32.totalorder %v25_v11, 1  ;;  %vm47_vm2 = vcmp.lt.s32.totalorder %v25_v11, 4  ;;  %p161_p4 = pnand %p160_p3, %p154_p0 }
  0x18   :  { %v28_v23 = vshrl.u32 %v177_v13, %v27_v12  ;;  %v30_v24 = vshrl.u32 %v178_v15, %v27_v12  ;;  %v33_v25 = vshrl.u32 %v179_v17, %v27_v12  ;;  %v36_v26 = vshrl.u32 %v180_v19, %v27_v12 }
  0x19   :  { %v39_v27 = vshrl.u32 %v181_v21, %v27_v12  ;;  %v42_v29 = vshrl.u32 %v182_v28, %v27_v12  ;;  %vm45_vm3 = vcmp.lt.s32.totalorder %v25_v11, 2  ;;  %vm46_vm4 = vcmp.lt.s32.totalorder %v25_v11, 3 }
  0x1a   :  { %v31_v31 = vor.u32 %v30_v24, %v29_v14  ;;  %v34_v32 = vor.u32 %v33_v25, %v32_v16  ;;  %v37_v33 = vor.u32 %v36_v26, %v35_v18 }
  0x1b   :  { %v40_v34 = vor.u32 %v39_v27, %v38_v20  ;;  %v43_v35 = vor.u32 %v42_v29, %v41_v22 }
  0x1c   :  { %v48_v36 = vsel %vm44_vm1, %v28_v23, %v31_v31  ;;  %v49_v37 = vsel %vm47_vm2, %v37_v33, 2102212464  ;;  %v52_v38 = vsel %vm44_vm1, %v31_v31, %v34_v32  ;;  %v56_v39 = vsel %vm44_vm1, %v34_v32, %v37_v33 }
  0x1d   :  { %v50_v40 = vsel %vm46_vm4, %v34_v32, %v49_v37  ;;  %v53_v41 = vsel %vm47_vm2, %v40_v34, 920167782  ;;  %v57_v42 = vsel %vm47_vm2, %v43_v35, 1326507024 }
  0x1e   :  { %v54_v43 = vsel %vm46_vm4, %v37_v33, %v53_v41  ;;  %v58_v44 = vsel %vm46_vm4, %v40_v34, %v57_v42  ;;  %v51_v45 = vsel %vm45_vm3, %v48_v36, %v50_v40 }
  0x1f   :  { %v55_v46 = vsel %vm45_vm3, %v52_v38, %v54_v43  ;;  %v59_v47 = vsel %vm45_vm3, %v56_v39, %v58_v44  ;;  %v67_v52 = vmul.u32 %v60_v30, %v51_v45 }
  0x20   :  { %v203_v48 = vmul.u32.u64.low %v60_v30, %v59_v47  ;;  %v204_v49 = vmul.u32.u64.high %v60_v30, %v59_v47, %v203_v48  ;;  %v206_v50 = vmul.u32.u64.low %v60_v30, %v55_v46  ;;  %v207_v51 = vmul.u32.u64.high %v60_v30, %v55_v46, %v206_v50 }
  0x22   :  { %vm69_vm5 = vc.u32 %v204_v49, %v206_v50  ;;  %v70_v53 = vadd.s32 1, %v207_v51  ;;  %v68_v0 = vadd.s32 %v206_v50, %v204_v49 }
  0x24   :  { %v71_v54 = vsel %vm69_vm5, %v70_v53, %v207_v51 }
  0x25   :  { %v72_v55 = vadd.s32 %v71_v54, %v67_v52 }
  0x27   :  { %v73_v56 = vadd.s32 536870912, %v72_v55 }
  0x29   :  { %v74_v57 = vshrl.u32 %v73_v56, 30 }
  0x2b   :  { %v75_v58 = vshll.u32 %v74_v57, 30  ;;  %v98_v14 = vsub.s32 4, %v74_v57 }
  0x2d   :  { %v76_v59 = vsub.s32 %v72_v55, %v75_v58  ;;  %v99_v17 = vsel %vm14_vm7, %v98_v14, %v74_v57 }
  0x2e   :  { %v101_v20 = vsel %vm13_vm8, 0, %v99_v17 }
  0x2f   :  { %v78_v60 = vsub.s32 0, %v76_v59  ;;  %v105_v21 = vadd.s32 3, %v101_v20 }
  0x31   :  { %v135_v61 = vmin.u32 %v78_v60, %v76_v59  ;;  %v106_v22 = vand.u32 3, %v105_v21 }
  0x33   :  { %v80_v62 = vclz %v135_v61  ;;  %vm111_vm9 = vcmp.eq.s32.totalorder %v106_v22, 2  ;;  %vm108_vm10 = vcmp.eq.s32.totalorder %v106_v22, 0  ;;  %vm107_vm11 = vcmp.lt.s32.totalorder %v106_v22, 2 }
  0x35   :  { %v136_v63 = vadd.s32 4294967294, %v80_v62 }
  0x37   :  { %vm137_vm6 = vcmp.lt.s32.totalorder %v136_v63, 0 }
  0x38   :  { %v83_v2 = vsel %vm137_vm6, 0, %v136_v63 }
  0x39   :  { %v84_v3 = vsub.s32 32, %v83_v2  ;;  %v85_v5 = vshll.u32 %v76_v59, %v83_v2  ;;  %v88_v6 = vsub.s32 4294967266, %v83_v2 }
  0x3b   :  { %v86_v7 = vshrl.u32 %v68_v0, %v84_v3  ;;  %v89_v8 = vadd.s32 127, %v88_v6 }
  0x3d   :  { %v87_v9 = vor.u32 %v86_v7, %v85_v5  ;;  %v90_v10 = vshll.u32 %v89_v8, 23 }
  0x3f   :  { %v91_v11 = vor.u32 4788187, %v90_v10  ;;  %v94_v12 = vcvt.s32.f32 %v87_v9 }
  0x41   :  { %v92_v13 = vand.u32 2147483647, %v91_v11 }
  0x43   :  { %v95_v15 = vmul.f32 %v94_v12, %v92_v13 }
  0x45   :  { %v96_v16 = vxor.u32 2147483648, %v95_v15 }
  0x47   :  { %v97_v18 = vsel %vm14_vm7, %v96_v16, %v95_v15 }
  0x48   :  { %v100_v19 = vsel %vm13_vm8, %v197_v1, %v97_v18 }
  0x49   :  { %149 = vcosq.f32 %v100_v19 }
  0x4a   :  { %151 = vsinq.f32 %v100_v19 }
  0x53   :  { %v150_v23 = vpop.eup %149 }
  0x54   :  { %v152_v24 = vpop.eup %151  ;;  %v112_v25 = vxor.u32 2147483648, %v150_v23 }
  0x55   :  { %v109_v26 = vxor.u32 2147483648, %v152_v24 }
  0x56   :  { %v113_v4 = vsel %vm111_vm9, %v112_v25, %v152_v24 }
  0x57   :  { %v110_v27 = vsel %vm108_vm10, %v150_v23, %v109_v26 }
  0x58   :  { %v114_v28 = vsel %vm107_vm11, %v110_v27, %v113_v4 }
  0x59   :  { %v115_v29 = vsel %vm104_vm12, nan, %v114_v28 }
  0x5a   :  { %v116_v30 = vadd.f32 1.0, %v115_v29 }
  0x5c   :  { %v117_v31 = vmul.f32 0.5, %v116_v30 }
  0x5e   :  { %119 = vst.msk [vmem:[#allocation3] sm:$0x1] %vm118_vm13, %v117_v31 }
  0x5f   :  { %164 = shalt.err (!%p161_p4)
}
  0x60   :  { %s165_s13 = scalar_lea.hbm %s231_s1, 16 }
  0x61   :  { %p166_p5 = scmp.ne.s32.totalorder %s231_s1, %s165_s13  ;;  %p169_p6 = scmp.lt.u32.totalorder %s165_s13, %s231_s1 }
  0x63   :  { %p171_p7 = pnand %p169_p6, %p166_p5 }
  0x65   :  { %174 = shalt.err (!%p171_p7)
}
  0x66   :  { %129 = dma.vmem_to_hbm [thread:$0]  %s127_s8, 16, %s231_s1, [#allocation4]  }
  0x67   :  { %175 = dma.done.wait [#allocation4], 16  }
  0x68   :  { %176 = vsyncadd [#allocation4], 4294967280 }
  0x69   :  { %133 = vsyncpa [#allocation4], 1 }

</bundles_post_ra>
